<compile_context>
chip_gen: v5e
topology: v5e:2x2
jax: 0.10.0
libtpu: 0.0.40
codegen_flags: <defaults>
</compile_context>

<pallas_src>
import jax
import jax.numpy as jnp
from jax.experimental import pallas as pl
from jax.experimental.pallas import tpu as pltpu


_F_CHUNK = 128   # faces per grid step along the reduction axis
_PIX_SUB = 256   # pixel sub-tile inside the kernel (bounds the one-hot to ~32 vregs)


def _round_up(x, m):
    return ((x + m - 1) // m) * m


def _phong_normal_kernel(idx_ref, table_ref, out_ref):
    # idx_ref:   (1, TILE)     int32  pix_to_face for this pixel tile (-1 = background)
    # table_ref: (3, F_CHUNK)  f32    summed-vertex-normal table, columns = face id
    # out_ref:   (3, TILE)     f32    accumulated pixel normals (revisited across f-chunks)
    j = pl.program_id(1)

    @pl.when(j == 0)
    def _():
        out_ref[...] = jnp.zeros_like(out_ref)

    tile = out_ref.shape[1]
    f_chunk = table_ref.shape[1]
    face_base = j * f_chunk
    table = table_ref[...]                                          # (3, F_CHUNK)

    # Static inner loop over pixel sub-tiles keeps the (F_CHUNK, SUB) one-hot
    # bounded to a few dozen vregs no matter how large the pixel tile is.
    # TODO(synk): for very large meshes a true O(P) gather (dynamic lane/sublane
    # gather or DMA gather) would beat this O(F*P) one-hot matmul; kept the
    # matmul path for guaranteed lowering on all TPU generations.
    for s in range(tile // _PIX_SUB):
        lo, hi = s * _PIX_SUB, (s + 1) * _PIX_SUB
        idx = idx_ref[:, lo:hi]                                     # (1, SUB)
        face_iota = jax.lax.broadcasted_iota(
            jnp.int32, (f_chunk, _PIX_SUB), 0) + face_base          # global face ids
        # Background (-1) and pad pixels match no face -> all-zero column -> 0,
        # exactly matching interpolate_face_attributes' masking of pix_to_face < 0.
        onehot = (face_iota == idx).astype(jnp.float32)             # (F_CHUNK, SUB)
        out_ref[:, lo:hi] += jnp.dot(table, onehot,
                                     preferred_element_type=jnp.float32)


def hard_phong_normal_shader(pix_to_face, bary_coords, faces, verts_normals,
                             *, tile=2048):
    """JAX/Pallas equivalent of HardPhongNormalShader.forward.

    pix_to_face:   (N, H, W, K) int32   fragments.pix_to_face (-1 = background)
    bary_coords:   (N, H, W, K, 3) f32  fragments.bary_coords (only its shape is
                                        used - the module interpolates with ones)
    faces:         (F, 3) int32         meshes.faces_packed()
    verts_normals: (V, 3) f32           meshes.verts_normals_packed()
    returns:       (N, H, W, K, 3) f32  pixel normals
    """
    del bary_coords  # module replaces it with ones_like; shape already known
    n, h, w, k = pix_to_face.shape
    num_faces = faces.shape[0]

    # Fold the unit barycentric weights on the host: per-face attribute is just
    # the sum of its 3 vertex normals -> (3, F) column-per-face table.
    faces_normals = verts_normals[faces]                           # (F, 3, 3)
    table = faces_normals.sum(axis=1).T.astype(jnp.float32)        # (3, F)
    f_pad = _round_up(max(num_faces, 1), _F_CHUNK)
    table = jnp.pad(table, ((0, 0), (0, f_pad - num_faces)))       # (3, F_pad)

    p = n * h * w * k
    tile_eff = max(_PIX_SUB, min(_round_up(tile, _PIX_SUB), _round_up(p, _PIX_SUB)))
    p_pad = _round_up(p, tile_eff)
    idx_flat = pix_to_face.reshape(-1).astype(jnp.int32)
    idx_flat = jnp.pad(idx_flat, (0, p_pad - p), constant_values=-1)[None, :]

    n_pix_tiles = p_pad // tile_eff
    n_f_chunks = f_pad // _F_CHUNK

    cost = pl.CostEstimate(
        flops=2 * 3 * f_pad * p_pad,
        transcendentals=0,
        bytes_accessed=(p_pad * 4                       # pix_to_face ids
                        + n_pix_tiles * 3 * f_pad * 4   # table streamed per pixel tile
                        + 3 * p_pad * 4))               # output normals

    out = pl.pallas_call(
        _phong_normal_kernel,
        out_shape=jax.ShapeDtypeStruct((3, p_pad), jnp.float32),
        grid=(n_pix_tiles, n_f_chunks),
        in_specs=[
            pl.BlockSpec((1, tile_eff), lambda i, j: (0, i)),   # pixel->face ids
            pl.BlockSpec((3, _F_CHUNK), lambda i, j: (0, j)),   # face-normal table chunk
        ],
        out_specs=pl.BlockSpec((3, tile_eff), lambda i, j: (0, i)),
        compiler_params=pltpu.CompilerParams(
            dimension_semantics=("parallel", "arbitrary")),
        cost_estimate=cost,
    )(idx_flat, table)                                          # (3, P_pad)

    # TODO(synk): downstream consumers that can take channels-first (3, P) should
    # skip this transpose - it is an extra full-output HBM round trip.
    return out[:, :p].T.reshape(n, h, w, k, 3)


def _reference(pix_to_face, bary_coords, faces, verts_normals):
    # Pure-JAX mirror of interpolate_face_attributes(pix_to_face, ones, vn[faces]).
    faces_normals = verts_normals[faces]                      # (F, 3, 3)
    mask = pix_to_face >= 0
    safe_idx = jnp.where(mask, pix_to_face, 0)
    gathered = faces_normals[safe_idx]                        # (N, H, W, K, 3, 3)
    ones = jnp.ones_like(bary_coords)
    out = (ones[..., None] * gathered).sum(axis=-2)           # (N, H, W, K, 3)
    return jnp.where(mask[..., None], out, 0.0)


if __name__ == "__main__":
    key = jax.random.PRNGKey(0)
    k1, k2, k3, k4 = jax.random.split(key, 4)

    N, H, W, K = 2, 16, 16, 2          # batch, image H, image W, faces-per-pixel
    V, F = 12, 20                      # packed vertices / packed faces

    verts_normals = jax.random.normal(k1, (V, 3), dtype=jnp.float32)
    verts_normals = verts_normals / jnp.linalg.norm(
        verts_normals, axis=-1, keepdims=True)
    faces = jax.random.randint(k2, (F, 3), 0, V, dtype=jnp.int32)
    pix_to_face = jax.random.randint(k3, (N, H, W, K), -1, F, dtype=jnp.int32)
    bary_coords = jax.random.uniform(k4, (N, H, W, K, 3), dtype=jnp.float32)

    out = hard_phong_normal_shader(pix_to_face, bary_coords, faces, verts_normals)
    out = jax.block_until_ready(out)

    ref = _reference(pix_to_face, bary_coords, faces, verts_normals)
    assert out.shape == (N, H, W, K, 3), out.shape
    assert out.dtype == jnp.float32
    assert jnp.allclose(out, ref, atol=1e-5), float(jnp.max(jnp.abs(out - ref)))
    print("KERNEL_OK")
</pallas_src>

<mosaic_0001>
module attributes {stable_mosaic.version = 11 : i64} {
  func.func @_phong_normal_kernel(%arg0: i32, %arg1: i32, %arg2: memref<1x1024xi32, #tpu.memory_space<vmem>>, %arg3: memref<3x128xf32, #tpu.memory_space<vmem>>, %arg4: memref<3x1024xf32, #tpu.memory_space<vmem>>) attributes {dimension_semantics = [#tpu.dimension_semantics<parallel>, #tpu.dimension_semantics<arbitrary>], iteration_bounds = array<i64: 1, 1>, scalar_prefetch = 0 : i64, scratch_operands = 0 : i64, tpu.core_type = #tpu.core_type<tc>, window_params = [{transform_indices = @transform_0, window_bounds = array<i64: 1, 1024>}, {transform_indices = @transform_1, window_bounds = array<i64: 3, 128>}, {transform_indices = @transform_2, window_bounds = array<i64: 3, 1024>}]} {
    %c0_i32 = arith.constant 0 : i32
    %0 = arith.cmpi eq, %arg1, %c0_i32 : i32
    %1 = arith.extui %0 : i1 to i32
    %c0_i32_0 = arith.constant 0 : i32
    %2 = arith.cmpi ne, %1, %c0_i32_0 : i32
    scf.if %2 {
      %cst_26 = arith.constant 0.000000e+00 : f32
      %53 = vector.broadcast %cst_26 : f32 to vector<3x1024xf32>
      %c0_27 = arith.constant 0 : index
      %c0_28 = arith.constant 0 : index
      %54 = vector.load %arg4[%c0_27, %c0_28] : memref<3x1024xf32, #tpu.memory_space<vmem>>, vector<3x1024xf32>
      tpu.vector_store %arg4[%c0_27, %c0_28], %53 {strides = array<i32>} : memref<3x1024xf32, #tpu.memory_space<vmem>>, vector<3x1024xf32>,
    } else {
    }
    %c128_i32 = arith.constant 128 : i32
    %3 = arith.muli %arg1, %c128_i32 : i32
    %c0 = arith.constant 0 : index
    %c0_1 = arith.constant 0 : index
    %4 = vector.load %arg3[%c0, %c0_1] : memref<3x128xf32, #tpu.memory_space<vmem>>, vector<3x128xf32>
    %c0_2 = arith.constant 0 : index
    %c0_3 = arith.constant 0 : index
    %5 = vector.load %arg2[%c0_2, %c0_3] : memref<1x1024xi32, #tpu.memory_space<vmem>>, vector<1x256xi32>
    %6 = tpu.iota {dimensions = array<i32: 0>} : vector<128x256xi32>
    %7 = vector.broadcast %3 : i32 to vector<128x256xi32>
    %8 = arith.addi %6, %7 : vector<128x256xi32>
    %9 = vector.broadcast %5 : vector<1x256xi32> to vector<128x256xi32>
    %10 = arith.cmpi eq, %8, %9 : vector<128x256xi32>
    %11 = arith.extui %10 : vector<128x256xi1> to vector<128x256xi32>
    %12 = arith.sitofp %11 : vector<128x256xi32> to vector<128x256xf32>
    %c0_4 = arith.constant 0 : index
    %c0_5 = arith.constant 0 : index
    %13 = vector.load %arg4[%c0_4, %c0_5] : memref<3x1024xf32, #tpu.memory_space<vmem>>, vector<3x256xf32>
    %cst = arith.constant dense<0.000000e+00> : vector<3x256xf32>
    %14 = tpu.matmul %4, %12, %cst {dimension_numbers = #tpu.dot_dimension_numbers<[1], [0], [0], [1], [0, 0, 1, 1], [], []>} : vector<3x128xf32>, vector<128x256xf32>, vector<3x256xf32> -> vector<3x256xf32>
    %15 = arith.addf %13, %14 : vector<3x256xf32>
    %c0_6 = arith.constant 0 : index
    %c0_7 = arith.constant 0 : index
    %16 = vector.load %arg4[%c0_6, %c0_7] : memref<3x1024xf32, #tpu.memory_space<vmem>>, vector<3x256xf32>
    tpu.vector_store %arg4[%c0_6, %c0_7], %15 {strides = array<i32>} : memref<3x1024xf32, #tpu.memory_space<vmem>>, vector<3x256xf32>,
    %c0_8 = arith.constant 0 : index
    %c256 = arith.constant 256 : index
    %17 = vector.load %arg2[%c0_8, %c256] : memref<1x1024xi32, #tpu.memory_space<vmem>>, vector<1x256xi32>
    %18 = tpu.iota {dimensions = array<i32: 0>} : vector<128x256xi32>
    %19 = vector.broadcast %3 : i32 to vector<128x256xi32>
    %20 = arith.addi %18, %19 : vector<128x256xi32>
    %21 = vector.broadcast %17 : vector<1x256xi32> to vector<128x256xi32>
    %22 = arith.cmpi eq, %20, %21 : vector<128x256xi32>
    %23 = arith.extui %22 : vector<128x256xi1> to vector<128x256xi32>
    %24 = arith.sitofp %23 : vector<128x256xi32> to vector<128x256xf32>
    %c0_9 = arith.constant 0 : index
    %c256_10 = arith.constant 256 : index
    %25 = vector.load %arg4[%c0_9, %c256_10] : memref<3x1024xf32, #tpu.memory_space<vmem>>, vector<3x256xf32>
    %cst_11 = arith.constant dense<0.000000e+00> : vector<3x256xf32>
    %26 = tpu.matmul %4, %24, %cst_11 {dimension_numbers = #tpu.dot_dimension_numbers<[1], [0], [0], [1], [0, 0, 1, 1], [], []>} : vector<3x128xf32>, vector<128x256xf32>, vector<3x256xf32> -> vector<3x256xf32>
    %27 = arith.addf %25, %26 : vector<3x256xf32>
    %c0_12 = arith.constant 0 : index
    %c256_13 = arith.constant 256 : index
    %28 = vector.load %arg4[%c0_12, %c256_13] : memref<3x1024xf32, #tpu.memory_space<vmem>>, vector<3x256xf32>
    tpu.vector_store %arg4[%c0_12, %c256_13], %27 {strides = array<i32>} : memref<3x1024xf32, #tpu.memory_space<vmem>>, vector<3x256xf32>,
    %c0_14 = arith.constant 0 : index
    %c512 = arith.constant 512 : index
    %29 = vector.load %arg2[%c0_14, %c512] : memref<1x1024xi32, #tpu.memory_space<vmem>>, vector<1x256xi32>
    %30 = tpu.iota {dimensions = array<i32: 0>} : vector<128x256xi32>
    %31 = vector.broadcast %3 : i32 to vector<128x256xi32>
    %32 = arith.addi %30, %31 : vector<128x256xi32>
    %33 = vector.broadcast %29 : vector<1x256xi32> to vector<128x256xi32>
    %34 = arith.cmpi eq, %32, %33 : vector<128x256xi32>
    %35 = arith.extui %34 : vector<128x256xi1> to vector<128x256xi32>
    %36 = arith.sitofp %35 : vector<128x256xi32> to vector<128x256xf32>
    %c0_15 = arith.constant 0 : index
    %c512_16 = arith.constant 512 : index
    %37 = vector.load %arg4[%c0_15, %c512_16] : memref<3x1024xf32, #tpu.memory_space<vmem>>, vector<3x256xf32>
    %cst_17 = arith.constant dense<0.000000e+00> : vector<3x256xf32>
    %38 = tpu.matmul %4, %36, %cst_17 {dimension_numbers = #tpu.dot_dimension_numbers<[1], [0], [0], [1], [0, 0, 1, 1], [], []>} : vector<3x128xf32>, vector<128x256xf32>, vector<3x256xf32> -> vector<3x256xf32>
    %39 = arith.addf %37, %38 : vector<3x256xf32>
    %c0_18 = arith.constant 0 : index
    %c512_19 = arith.constant 512 : index
    %40 = vector.load %arg4[%c0_18, %c512_19] : memref<3x1024xf32, #tpu.memory_space<vmem>>, vector<3x256xf32>
    tpu.vector_store %arg4[%c0_18, %c512_19], %39 {strides = array<i32>} : memref<3x1024xf32, #tpu.memory_space<vmem>>, vector<3x256xf32>,
    %c0_20 = arith.constant 0 : index
    %c768 = arith.constant 768 : index
    %41 = vector.load %arg2[%c0_20, %c768] : memref<1x1024xi32, #tpu.memory_space<vmem>>, vector<1x256xi32>
    %42 = tpu.iota {dimensions = array<i32: 0>} : vector<128x256xi32>
    %43 = vector.broadcast %3 : i32 to vector<128x256xi32>
    %44 = arith.addi %42, %43 : vector<128x256xi32>
    %45 = vector.broadcast %41 : vector<1x256xi32> to vector<128x256xi32>
    %46 = arith.cmpi eq, %44, %45 : vector<128x256xi32>
    %47 = arith.extui %46 : vector<128x256xi1> to vector<128x256xi32>
    %48 = arith.sitofp %47 : vector<128x256xi32> to vector<128x256xf32>
    %c0_21 = arith.constant 0 : index
    %c768_22 = arith.constant 768 : index
    %49 = vector.load %arg4[%c0_21, %c768_22] : memref<3x1024xf32, #tpu.memory_space<vmem>>, vector<3x256xf32>
    %cst_23 = arith.constant dense<0.000000e+00> : vector<3x256xf32>
    %50 = tpu.matmul %4, %48, %cst_23 {dimension_numbers = #tpu.dot_dimension_numbers<[1], [0], [0], [1], [0, 0, 1, 1], [], []>} : vector<3x128xf32>, vector<128x256xf32>, vector<3x256xf32> -> vector<3x256xf32>
    %51 = arith.addf %49, %50 : vector<3x256xf32>
    %c0_24 = arith.constant 0 : index
    %c768_25 = arith.constant 768 : index
    %52 = vector.load %arg4[%c0_24, %c768_25] : memref<3x1024xf32, #tpu.memory_space<vmem>>, vector<3x256xf32>
    tpu.vector_store %arg4[%c0_24, %c768_25], %51 {strides = array<i32>} : memref<3x1024xf32, #tpu.memory_space<vmem>>, vector<3x256xf32>,
    return
  }
  func.func @transform_0(%arg0: i32, %arg1: i32) -> (i32, i32) {
    %c0_i32 = arith.constant 0 : i32
    %c0_i32_0 = arith.constant 0 : i32
    return %c0_i32, %arg0 : i32, i32
  }
  func.func @transform_1(%arg0: i32, %arg1: i32) -> (i32, i32) {
    %c0_i32 = arith.constant 0 : i32
    %c0_i32_0 = arith.constant 0 : i32
    return %c0_i32, %arg1 : i32, i32
  }
  func.func @transform_2(%arg0: i32, %arg1: i32) -> (i32, i32) {
    %c0_i32 = arith.constant 0 : i32
    %c0_i32_0 = arith.constant 0 : i32
    return %c0_i32, %arg0 : i32, i32
  }
}

</mosaic_0001>

<bundles_post_ra>
// kernel: tpu_custom_call.1
= control target key start
LH: loop header
LB: loop body
LE: loop exit
PB: predicated region body
PF: predicated region fallthrough
CT: control target
= control target key end

     0   :  { %7 = vsyncpa [#allocation3], 0  ;;  %s1510_s0 = inlined_call_operand.hbm [shape: s32[1,1024], index: 0, kind: input, shape index: {}]   ;;  %s1511_s1 = inlined_call_operand.hbm [shape: f32[3,128], index: 1, kind: input, shape index: {}]   ;;  %s1512_s2 = inlined_call_operand.hbm [shape: f32[3,1024], index: 2, kind: output, shape index: {}]  }
   0x1   :  { %8 = vsyncpa [#allocation6], 0 }
   0x2   :  { %9 = vsyncpa [#allocation4], 0  ;;  %s15_s11 = sshll.u32 %s1510_s0, 4  ;;  %s1030_s12 = smov [#allocation2]   ;;  %s16_s11 = int_to_ptr.hbm [resolvable:$true] %s15_s11 }
   0x3   :  { %s17_s13 = sshll.u32 %s1030_s12, 4  ;;  %s26_s16 = sshll.u32 %s1511_s1, 4  ;;  %s18_s13 = int_to_ptr.vmem [resolvable:$true] %s17_s13  ;;  %s27_s16 = int_to_ptr.hbm [resolvable:$true] %s26_s16 }
   0x4   :  { %20 = dma.hbm_to_vmem [thread:$0]  %s16_s11, 128, %s18_s13, [#allocation3]  }
   0x5   :  { %s1031_s17 = smov [#allocation5]  }
   0x6   :  { %s28_s18 = sshll.u32 %s1031_s17, 4  ;;  %s29_s18 = int_to_ptr.vmem [resolvable:$true] %s28_s18 }
   0x7   :  { %31 = dma.hbm_to_vmem [thread:$0]  %s27_s16, 64, %s29_s18, [#allocation6]  }
   0x8   :  { %1024 = dma.done.wait [#allocation3], 128  }
   0x9   :  { %1025 = vsyncadd [#allocation3], 4294967168 }
   0xa   :  { %1026 = dma.done.wait [#allocation6], 64  }
   0xb   :  { %1027 = vsyncadd [#allocation6], 4294967232  ;;  %v51_v0 = vlaneseq  ;;  %v232_v4 = vld [vmem:[#allocation2 + $0x2] sm:$0x3]  ;;  %v50_v6 = vld [vmem:[#allocation2] sm:$0x3] }
   0xc   :  { %v1067_v7 = vperm.slane %v232_v4, 1  ;;  %v1069_v8 = vperm.slane %v232_v4, 0  ;;  %v1071_v9 = vperm.slane %v50_v6, 1  ;;  %v1073_v10 = vperm.slane %v50_v6, 0  ;;  %v526_v24 = vld [vmem:[#allocation2 + $0x6] sm:$0x3] }
   0xd   :  { %v1056_v1 = vshrl.u32 %v51_v0, 7  ;;  %v1032_v12 = vmov 1.0   ;;  %v1266_v25 = vperm.slane %v526_v24, 1  ;;  %v1272_v26 = vperm.slane %v526_v24, 0  ;;  %v379_v27 = vld [vmem:[#allocation2 + $0x4] sm:$0x3] }
   0xe   :  { %v1292_v28 = vperm.slane %v379_v27, 1  ;;  %v1306_v29 = vperm.slane %v379_v27, 0  ;;  %v49_v30 = vld [vmem:[#allocation5] sm:$0x7]  ;;  %v1033_v31 = vmov 0.0   ;;  %s1034_s0 = smov [#allocation7]  }
   0xf   :  { %v1059_v2 = vadd.s32 120, %v1056_v1  ;;  %v1062_v3 = vadd.s32 112, %v1056_v1  ;;  %v1065_v5 = vadd.s32 104, %v1056_v1  ;;  %v1076_v11 = vadd.s32 96, %v1056_v1  ;;  %44 = vst [vmem:[#allocation7] sm:$0x77] %v1033_v31 }
  0x10   :  { %v1091_v13 = vadd.s32 88, %v1056_v1  ;;  %v1115_v14 = vadd.s32 80, %v1056_v1  ;;  %v1130_v15 = vadd.s32 72, %v1056_v1  ;;  %v1145_v16 = vadd.s32 64, %v1056_v1  ;;  %45 = vst [vmem:[#allocation7 + $0x8] sm:$0x77] %v1033_v31 }
  0x11   :  { %vm266_vm0 = vcmp.eq.s32.totalorder %v1059_v2, %v1067_v7  ;;  %vm265_vm1 = vcmp.eq.s32.totalorder %v1059_v2, %v1069_v8  ;;  %vm264_vm2 = vcmp.eq.s32.totalorder %v1062_v3, %v1067_v7  ;;  %vm263_vm3 = vcmp.eq.s32.totalorder %v1062_v3, %v1069_v8  ;;  %46 = vst [vmem:[#allocation7 + $0x10] sm:$0x77] %v1033_v31  ;;  %s678_s1 = sshll.u32 %s1034_s0, 4  ;;  %s680_s21 = sshll.u32 %s1512_s2, 4  ;;  %s679_s1 = int_to_ptr.vmem [resolvable:$true] %s678_s1  ;;  %s681_s21 = int_to_ptr.hbm [resolvable:$true] %s680_s21 }
  0x12   :  { %803 = vmatpush.msk.msra.mxu3 %vm266_vm0, %v1032_v12  ;;  %787 = vmatpush.msk.msra.mxu2 %vm265_vm1, %v1032_v12  ;;  %vm118_vm4 = vcmp.eq.s32.totalorder %v1059_v2, %v1071_v9  ;;  %vm262_vm5 = vcmp.eq.s32.totalorder %v1065_v5, %v1067_v7  ;;  %vm261_vm6 = vcmp.eq.s32.totalorder %v1065_v5, %v1069_v8  ;;  %v1160_v17 = vadd.s32 56, %v1056_v1 }
  0x13   :  { %739 = vmatpush.msk.msra.mxu1 %vm118_vm4, %v1032_v12  ;;  %vm117_vm7 = vcmp.eq.s32.totalorder %v1059_v2, %v1073_v10  ;;  %vm116_vm8 = vcmp.eq.s32.totalorder %v1062_v3, %v1071_v9  ;;  %vm115_vm9 = vcmp.eq.s32.totalorder %v1062_v3, %v1073_v10  ;;  %vm114_vm10 = vcmp.eq.s32.totalorder %v1065_v5, %v1071_v9 }
  0x14   :  { %804 = vmatpush.msk.msra.mxu3 %vm264_vm2, %v1032_v12  ;;  %788 = vmatpush.msk.msra.mxu2 %vm263_vm3, %v1032_v12  ;;  %vm260_vm11 = vcmp.eq.s32.totalorder %v1076_v11, %v1067_v7  ;;  %vm259_vm12 = vcmp.eq.s32.totalorder %v1076_v11, %v1069_v8  ;;  %vm113_vm13 = vcmp.eq.s32.totalorder %v1065_v5, %v1073_v10  ;;  %v1175_v18 = vadd.s32 48, %v1056_v1 }
  0x15   :  { %723 = vmatpush.msk.msra.mxu0 %vm117_vm7, %v1032_v12  ;;  %740 = vmatpush.msk.msra.mxu1 %vm116_vm8, %v1032_v12  ;;  %vm112_vm14 = vcmp.eq.s32.totalorder %v1076_v11, %v1071_v9  ;;  %vm258_vm15 = vcmp.eq.s32.totalorder %v1091_v13, %v1067_v7  ;;  %vm257_vm0 = vcmp.eq.s32.totalorder %v1091_v13, %v1069_v8  ;;  %v1190_v19 = vadd.s32 40, %v1056_v1 }
  0x16   :  { %805 = vmatpush.msk.msra.mxu3 %vm262_vm5, %v1032_v12  ;;  %789 = vmatpush.msk.msra.mxu2 %vm261_vm6, %v1032_v12  ;;  %vm111_vm1 = vcmp.eq.s32.totalorder %v1076_v11, %v1073_v10  ;;  %vm110_vm2 = vcmp.eq.s32.totalorder %v1091_v13, %v1071_v9  ;;  %vm256_vm3 = vcmp.eq.s32.totalorder %v1115_v14, %v1067_v7  ;;  %v1205_v20 = vadd.s32 32, %v1056_v1  ;;  %v183_v37 = vld [vmem:[#allocation7] sm:$0x77] }
  0x17   :  { %724 = vmatpush.msk.msra.mxu0 %vm115_vm9, %v1032_v12  ;;  %741 = vmatpush.msk.msra.mxu1 %vm114_vm10, %v1032_v12  ;;  %vm255_vm4 = vcmp.eq.s32.totalorder %v1115_v14, %v1069_v8  ;;  %vm109_vm5 = vcmp.eq.s32.totalorder %v1091_v13, %v1073_v10  ;;  %vm108_vm6 = vcmp.eq.s32.totalorder %v1115_v14, %v1071_v9  ;;  %v1220_v21 = vadd.s32 24, %v1056_v1  ;;  %v331_v36 = vld [vmem:[#allocation7 + $0x8] sm:$0x77] }
  0x18   :  { %806 = vmatpush.msk.msra.mxu3 %vm260_vm11, %v1032_v12  ;;  %790 = vmatpush.msk.msra.mxu2 %vm259_vm12, %v1032_v12  ;;  %vm254_vm7 = vcmp.eq.s32.totalorder %v1130_v15, %v1067_v7  ;;  %vm253_vm8 = vcmp.eq.s32.totalorder %v1130_v15, %v1069_v8  ;;  %vm107_vm9 = vcmp.eq.s32.totalorder %v1115_v14, %v1073_v10  ;;  %v1235_v22 = vadd.s32 16, %v1056_v1  ;;  %v478_v48 = vld [vmem:[#allocation7 + $0x10] sm:$0x77] }
  0x19   :  { %725 = vmatpush.msk.msra.mxu0 %vm113_vm13, %v1032_v12  ;;  %742 = vmatpush.msk.msra.mxu1 %vm112_vm14, %v1032_v12  ;;  %vm106_vm10 = vcmp.eq.s32.totalorder %v1130_v15, %v1071_v9  ;;  %vm252_vm11 = vcmp.eq.s32.totalorder %v1145_v16, %v1067_v7  ;;  %vm251_vm12 = vcmp.eq.s32.totalorder %v1145_v16, %v1069_v8  ;;  %v1250_v23 = vadd.s32 8, %v1056_v1 }
  0x1a   :  { %807 = vmatpush.msk.msra.mxu3 %vm258_vm15, %v1032_v12  ;;  %791 = vmatpush.msk.msra.mxu2 %vm257_vm0, %v1032_v12  ;;  %vm105_vm13 = vcmp.eq.s32.totalorder %v1130_v15, %v1073_v10  ;;  %vm104_vm14 = vcmp.eq.s32.totalorder %v1145_v16, %v1071_v9  ;;  %vm250_vm15 = vcmp.eq.s32.totalorder %v1160_v17, %v1067_v7 }
  0x1b   :  { %726 = vmatpush.msk.msra.mxu0 %vm111_vm1, %v1032_v12  ;;  %743 = vmatpush.msk.msra.mxu1 %vm110_vm2, %v1032_v12  ;;  %vm249_vm0 = vcmp.eq.s32.totalorder %v1160_v17, %v1069_v8  ;;  %vm103_vm1 = vcmp.eq.s32.totalorder %v1145_v16, %v1073_v10  ;;  %vm102_vm2 = vcmp.eq.s32.totalorder %v1160_v17, %v1071_v9 }
  0x1c   :  { %808 = vmatpush.msk.msra.mxu3 %vm256_vm3, %v1032_v12  ;;  %792 = vmatpush.msk.msra.mxu2 %vm255_vm4, %v1032_v12  ;;  %vm248_vm3 = vcmp.eq.s32.totalorder %v1175_v18, %v1067_v7  ;;  %vm247_vm4 = vcmp.eq.s32.totalorder %v1175_v18, %v1069_v8  ;;  %47 = vst [vmem:[#allocation7 + $0x18] sm:$0x77] %v1033_v31 }
  0x1d   :  { %727 = vmatpush.msk.msra.mxu0 %vm109_vm5, %v1032_v12  ;;  %744 = vmatpush.msk.msra.mxu1 %vm108_vm6, %v1032_v12  ;;  %vm101_vm5 = vcmp.eq.s32.totalorder %v1160_v17, %v1073_v10  ;;  %vm100_vm6 = vcmp.eq.s32.totalorder %v1175_v18, %v1071_v9 }
  0x1e   :  { %809 = vmatpush.msk.msra.mxu3 %vm254_vm7, %v1032_v12  ;;  %793 = vmatpush.msk.msra.mxu2 %vm253_vm8, %v1032_v12  ;;  %vm246_vm7 = vcmp.eq.s32.totalorder %v1190_v19, %v1067_v7  ;;  %vm245_vm8 = vcmp.eq.s32.totalorder %v1190_v19, %v1069_v8 }
  0x1f   :  { %728 = vmatpush.msk.msra.mxu0 %vm107_vm9, %v1032_v12  ;;  %745 = vmatpush.msk.msra.mxu1 %vm106_vm10, %v1032_v12  ;;  %vm99_vm9 = vcmp.eq.s32.totalorder %v1175_v18, %v1073_v10  ;;  %vm98_vm10 = vcmp.eq.s32.totalorder %v1190_v19, %v1071_v9 }
  0x20   :  { %810 = vmatpush.msk.msra.mxu3 %vm252_vm11, %v1032_v12  ;;  %794 = vmatpush.msk.msra.mxu2 %vm251_vm12, %v1032_v12  ;;  %vm244_vm11 = vcmp.eq.s32.totalorder %v1205_v20, %v1067_v7  ;;  %vm243_vm12 = vcmp.eq.s32.totalorder %v1205_v20, %v1069_v8 }
  0x21   :  { %729 = vmatpush.msk.msra.mxu0 %vm105_vm13, %v1032_v12  ;;  %746 = vmatpush.msk.msra.mxu1 %vm104_vm14, %v1032_v12  ;;  %vm97_vm13 = vcmp.eq.s32.totalorder %v1190_v19, %v1073_v10  ;;  %vm96_vm14 = vcmp.eq.s32.totalorder %v1205_v20, %v1071_v9 }
  0x22   :  { %811 = vmatpush.msk.msra.mxu3 %vm250_vm15, %v1032_v12  ;;  %795 = vmatpush.msk.msra.mxu2 %vm249_vm0, %v1032_v12  ;;  %vm242_vm15 = vcmp.eq.s32.totalorder %v1220_v21, %v1067_v7  ;;  %vm241_vm0 = vcmp.eq.s32.totalorder %v1220_v21, %v1069_v8 }
  0x23   :  { %730 = vmatpush.msk.msra.mxu0 %vm103_vm1, %v1032_v12  ;;  %747 = vmatpush.msk.msra.mxu1 %vm102_vm2, %v1032_v12  ;;  %vm95_vm1 = vcmp.eq.s32.totalorder %v1205_v20, %v1073_v10  ;;  %vm94_vm2 = vcmp.eq.s32.totalorder %v1220_v21, %v1071_v9  ;;  %v625_v50 = vld [vmem:[#allocation7 + $0x18] sm:$0x77] }
  0x24   :  { %812 = vmatpush.msk.msra.mxu3 %vm248_vm3, %v1032_v12  ;;  %796 = vmatpush.msk.msra.mxu2 %vm247_vm4, %v1032_v12  ;;  %vm240_vm3 = vcmp.eq.s32.totalorder %v1235_v22, %v1067_v7  ;;  %vm239_vm4 = vcmp.eq.s32.totalorder %v1235_v22, %v1069_v8 }
  0x25   :  { %731 = vmatpush.msk.msra.mxu0 %vm101_vm5, %v1032_v12  ;;  %748 = vmatpush.msk.msra.mxu1 %vm100_vm6, %v1032_v12  ;;  %vm93_vm5 = vcmp.eq.s32.totalorder %v1220_v21, %v1073_v10  ;;  %vm92_vm6 = vcmp.eq.s32.totalorder %v1235_v22, %v1071_v9 }
  0x26   :  { %813 = vmatpush.msk.msra.mxu3 %vm246_vm7, %v1032_v12  ;;  %797 = vmatpush.msk.msra.mxu2 %vm245_vm8, %v1032_v12  ;;  %vm238_vm7 = vcmp.eq.s32.totalorder %v1250_v23, %v1067_v7  ;;  %vm237_vm8 = vcmp.eq.s32.totalorder %v1250_v23, %v1069_v8 }
  0x27   :  { %732 = vmatpush.msk.msra.mxu0 %vm99_vm9, %v1032_v12  ;;  %749 = vmatpush.msk.msra.mxu1 %vm98_vm10, %v1032_v12  ;;  %vm91_vm9 = vcmp.eq.s32.totalorder %v1235_v22, %v1073_v10  ;;  %vm90_vm10 = vcmp.eq.s32.totalorder %v1250_v23, %v1071_v9 }
  0x28   :  { %814 = vmatpush.msk.msra.mxu3 %vm244_vm11, %v1032_v12  ;;  %798 = vmatpush.msk.msra.mxu2 %vm243_vm12, %v1032_v12  ;;  %vm236_vm11 = vcmp.eq.s32.totalorder %v1056_v1, %v1067_v7  ;;  %vm235_vm12 = vcmp.eq.s32.totalorder %v1056_v1, %v1069_v8 }
  0x29   :  { %733 = vmatpush.msk.msra.mxu0 %vm97_vm13, %v1032_v12  ;;  %750 = vmatpush.msk.msra.mxu1 %vm96_vm14, %v1032_v12  ;;  %vm560_vm13 = vcmp.eq.s32.totalorder %v1059_v2, %v1266_v25  ;;  %vm559_vm14 = vcmp.eq.s32.totalorder %v1059_v2, %v1272_v26 }
  0x2a   :  { %815 = vmatpush.msk.msra.mxu3 %vm242_vm15, %v1032_v12  ;;  %799 = vmatpush.msk.msra.mxu2 %vm241_vm0, %v1032_v12  ;;  %vm89_vm15 = vcmp.eq.s32.totalorder %v1250_v23, %v1073_v10  ;;  %vm88_vm0 = vcmp.eq.s32.totalorder %v1056_v1, %v1071_v9 }
  0x2b   :  { %734 = vmatpush.msk.msra.mxu0 %vm95_vm1, %v1032_v12  ;;  %751 = vmatpush.msk.msra.mxu1 %vm94_vm2, %v1032_v12  ;;  %vm558_vm1 = vcmp.eq.s32.totalorder %v1062_v3, %v1266_v25  ;;  %vm557_vm2 = vcmp.eq.s32.totalorder %v1062_v3, %v1272_v26 }
  0x2c   :  { %816 = vmatpush.msk.msra.mxu3 %vm240_vm3, %v1032_v12  ;;  %800 = vmatpush.msk.msra.mxu2 %vm239_vm4, %v1032_v12  ;;  %vm413_vm3 = vcmp.eq.s32.totalorder %v1059_v2, %v1292_v28  ;;  %vm87_vm4 = vcmp.eq.s32.totalorder %v1056_v1, %v1073_v10 }
  0x2d   :  { %735 = vmatpush.msk.msra.mxu0 %vm93_vm5, %v1032_v12  ;;  %752 = vmatpush.msk.msra.mxu1 %vm92_vm6, %v1032_v12  ;;  %vm556_vm5 = vcmp.eq.s32.totalorder %v1065_v5, %v1266_v25  ;;  %vm555_vm6 = vcmp.eq.s32.totalorder %v1065_v5, %v1272_v26 }
  0x2e   :  { %817 = vmatpush.msk.msra.mxu3 %vm238_vm7, %v1032_v12  ;;  %801 = vmatpush.msk.msra.mxu2 %vm237_vm8, %v1032_v12  ;;  %vm412_vm7 = vcmp.eq.s32.totalorder %v1059_v2, %v1306_v29  ;;  %vm411_vm8 = vcmp.eq.s32.totalorder %v1062_v3, %v1292_v28 }
  0x2f   :  { %736 = vmatpush.msk.msra.mxu0 %vm91_vm9, %v1032_v12  ;;  %753 = vmatpush.msk.msra.mxu1 %vm90_vm10, %v1032_v12  ;;  %vm554_vm9 = vcmp.eq.s32.totalorder %v1076_v11, %v1266_v25  ;;  %vm553_vm10 = vcmp.eq.s32.totalorder %v1076_v11, %v1272_v26 }
  0x30   :  { %818 = vmatpush.msk.msra.mxu3 %vm236_vm11, %v1032_v12  ;;  %802 = vmatpush.msk.msra.mxu2 %vm235_vm12, %v1032_v12  ;;  %vm410_vm11 = vcmp.eq.s32.totalorder %v1062_v3, %v1306_v29  ;;  %vm409_vm12 = vcmp.eq.s32.totalorder %v1065_v5, %v1292_v28 }
  0x31   :  { %737 = vmatpush.msk.msra.mxu0 %vm89_vm15, %v1032_v12  ;;  %754 = vmatpush.msk.msra.mxu1 %vm88_vm0, %v1032_v12  ;;  %vm408_vm15 = vcmp.eq.s32.totalorder %v1065_v5, %v1306_v29  ;;  %vm407_vm0 = vcmp.eq.s32.totalorder %v1076_v11, %v1292_v28 }
  0x32   :  { %931 = vmatpush.msk.msrb.mxu3 %vm560_vm13, %v1032_v12  ;;  %915 = vmatpush.msk.msrb.mxu2 %vm559_vm14, %v1032_v12  ;;  %vm552_vm13 = vcmp.eq.s32.totalorder %v1091_v13, %v1266_v25  ;;  %vm551_vm14 = vcmp.eq.s32.totalorder %v1091_v13, %v1272_v26 }
  0x33   :  { %867 = vmatpush.msk.msrb.mxu1 %vm413_vm3, %v1032_v12  ;;  %738 = vmatpush.msk.msra.mxu0 %vm87_vm4, %v1032_v12  ;;  %vm406_vm3 = vcmp.eq.s32.totalorder %v1076_v11, %v1306_v29  ;;  %vm405_vm4 = vcmp.eq.s32.totalorder %v1091_v13, %v1292_v28 }
  0x34   :  { %932 = vmatpush.msk.msrb.mxu3 %vm558_vm1, %v1032_v12  ;;  %916 = vmatpush.msk.msrb.mxu2 %vm557_vm2, %v1032_v12  ;;  %vm550_vm1 = vcmp.eq.s32.totalorder %v1115_v14, %v1266_v25  ;;  %vm549_vm2 = vcmp.eq.s32.totalorder %v1115_v14, %v1272_v26 }
  0x35   :  { %851 = vmatpush.msk.msrb.mxu0 %vm412_vm7, %v1032_v12  ;;  %868 = vmatpush.msk.msrb.mxu1 %vm411_vm8, %v1032_v12  ;;  %vm404_vm7 = vcmp.eq.s32.totalorder %v1091_v13, %v1306_v29  ;;  %vm403_vm8 = vcmp.eq.s32.totalorder %v1115_v14, %v1292_v28 }
  0x36   :  { %933 = vmatpush.msk.msrb.mxu3 %vm556_vm5, %v1032_v12  ;;  %917 = vmatpush.msk.msrb.mxu2 %vm555_vm6, %v1032_v12  ;;  %vm548_vm5 = vcmp.eq.s32.totalorder %v1130_v15, %v1266_v25  ;;  %vm547_vm6 = vcmp.eq.s32.totalorder %v1130_v15, %v1272_v26 }
  0x37   :  { %852 = vmatpush.msk.msrb.mxu0 %vm410_vm11, %v1032_v12  ;;  %869 = vmatpush.msk.msrb.mxu1 %vm409_vm12, %v1032_v12  ;;  %vm402_vm11 = vcmp.eq.s32.totalorder %v1115_v14, %v1306_v29  ;;  %vm401_vm12 = vcmp.eq.s32.totalorder %v1130_v15, %v1292_v28 }
  0x38   :  { %934 = vmatpush.msk.msrb.mxu3 %vm554_vm9, %v1032_v12  ;;  %918 = vmatpush.msk.msrb.mxu2 %vm553_vm10, %v1032_v12  ;;  %vm546_vm9 = vcmp.eq.s32.totalorder %v1145_v16, %v1266_v25  ;;  %vm545_vm10 = vcmp.eq.s32.totalorder %v1145_v16, %v1272_v26 }
  0x39   :  { %853 = vmatpush.msk.msrb.mxu0 %vm408_vm15, %v1032_v12  ;;  %870 = vmatpush.msk.msrb.mxu1 %vm407_vm0, %v1032_v12  ;;  %vm400_vm15 = vcmp.eq.s32.totalorder %v1130_v15, %v1306_v29  ;;  %vm399_vm0 = vcmp.eq.s32.totalorder %v1145_v16, %v1292_v28 }
  0x3a   :  { %935 = vmatpush.msk.msrb.mxu3 %vm552_vm13, %v1032_v12  ;;  %919 = vmatpush.msk.msrb.mxu2 %vm551_vm14, %v1032_v12  ;;  %vm544_vm13 = vcmp.eq.s32.totalorder %v1160_v17, %v1266_v25  ;;  %vm543_vm14 = vcmp.eq.s32.totalorder %v1160_v17, %v1272_v26 }
  0x3b   :  { %854 = vmatpush.msk.msrb.mxu0 %vm406_vm3, %v1032_v12  ;;  %871 = vmatpush.msk.msrb.mxu1 %vm405_vm4, %v1032_v12  ;;  %vm398_vm3 = vcmp.eq.s32.totalorder %v1145_v16, %v1306_v29  ;;  %vm397_vm4 = vcmp.eq.s32.totalorder %v1160_v17, %v1292_v28 }
  0x3c   :  { %936 = vmatpush.msk.msrb.mxu3 %vm550_vm1, %v1032_v12  ;;  %920 = vmatpush.msk.msrb.mxu2 %vm549_vm2, %v1032_v12  ;;  %vm542_vm1 = vcmp.eq.s32.totalorder %v1175_v18, %v1266_v25  ;;  %vm541_vm2 = vcmp.eq.s32.totalorder %v1175_v18, %v1272_v26 }
  0x3d   :  { %855 = vmatpush.msk.msrb.mxu0 %vm404_vm7, %v1032_v12  ;;  %872 = vmatpush.msk.msrb.mxu1 %vm403_vm8, %v1032_v12  ;;  %vm396_vm7 = vcmp.eq.s32.totalorder %v1160_v17, %v1306_v29  ;;  %vm538_vm8 = vcmp.eq.s32.totalorder %v1205_v20, %v1266_v25 }
  0x3e   :  { %937 = vmatpush.msk.msrb.mxu3 %vm548_vm5, %v1032_v12  ;;  %921 = vmatpush.msk.msrb.mxu2 %vm547_vm6, %v1032_v12  ;;  %vm540_vm5 = vcmp.eq.s32.totalorder %v1190_v19, %v1266_v25  ;;  %vm539_vm6 = vcmp.eq.s32.totalorder %v1190_v19, %v1272_v26 }
  0x3f   :  { %856 = vmatpush.msk.msrb.mxu0 %vm402_vm11, %v1032_v12  ;;  %873 = vmatpush.msk.msrb.mxu1 %vm401_vm12, %v1032_v12  ;;  %vm394_vm11 = vcmp.eq.s32.totalorder %v1175_v18, %v1306_v29  ;;  %vm536_vm12 = vcmp.eq.s32.totalorder %v1220_v21, %v1266_v25 }
  0x40   :  { %938 = vmatpush.msk.msrb.mxu3 %vm546_vm9, %v1032_v12  ;;  %922 = vmatpush.msk.msrb.mxu2 %vm545_vm10, %v1032_v12  ;;  %vm395_vm9 = vcmp.eq.s32.totalorder %v1175_v18, %v1292_v28  ;;  %vm537_vm10 = vcmp.eq.s32.totalorder %v1205_v20, %v1272_v26 }
  0x41   :  { %857 = vmatpush.msk.msrb.mxu0 %vm400_vm15, %v1032_v12  ;;  %874 = vmatpush.msk.msrb.mxu1 %vm399_vm0, %v1032_v12  ;;  %vm534_vm15 = vcmp.eq.s32.totalorder %v1235_v22, %v1266_v25  ;;  %vm392_vm0 = vcmp.eq.s32.totalorder %v1190_v19, %v1306_v29 }
  0x42   :  { %939 = vmatpush.msk.msrb.mxu3 %vm544_vm13, %v1032_v12  ;;  %923 = vmatpush.msk.msrb.mxu2 %vm543_vm14, %v1032_v12  ;;  %vm393_vm13 = vcmp.eq.s32.totalorder %v1190_v19, %v1292_v28  ;;  %vm535_vm14 = vcmp.eq.s32.totalorder %v1220_v21, %v1272_v26 }
  0x43   :  { %858 = vmatpush.msk.msrb.mxu0 %vm398_vm3, %v1032_v12  ;;  %875 = vmatpush.msk.msrb.mxu1 %vm397_vm4, %v1032_v12  ;;  %vm532_vm3 = vcmp.eq.s32.totalorder %v1250_v23, %v1266_v25  ;;  %vm390_vm4 = vcmp.eq.s32.totalorder %v1205_v20, %v1306_v29 }
  0x44   :  { %940 = vmatpush.msk.msrb.mxu3 %vm542_vm1, %v1032_v12  ;;  %924 = vmatpush.msk.msrb.mxu2 %vm541_vm2, %v1032_v12  ;;  %vm391_vm1 = vcmp.eq.s32.totalorder %v1205_v20, %v1292_v28  ;;  %vm533_vm2 = vcmp.eq.s32.totalorder %v1235_v22, %v1272_v26 }
  0x45   :  { %368 = vmatmul.f32.vlgmr.msra.gmra.mxu3 %v49_v30  ;;  %859 = vmatpush.msk.msrb.mxu0 %vm396_vm7, %v1032_v12  ;;  %vm530_vm7 = vcmp.eq.s32.totalorder %v1056_v1, %v1266_v25 }
  0x46   :  { %941 = vmatpush.msk.msrb.mxu3 %vm540_vm5, %v1032_v12  ;;  %925 = vmatpush.msk.msrb.mxu2 %vm539_vm6, %v1032_v12  ;;  %vm389_vm5 = vcmp.eq.s32.totalorder %v1220_v21, %v1292_v28  ;;  %vm531_vm6 = vcmp.eq.s32.totalorder %v1250_v23, %v1272_v26 }
  0x47   :  { %876 = vmatpush.msk.msrb.mxu1 %vm395_vm9, %v1032_v12  ;;  %860 = vmatpush.msk.msrb.mxu0 %vm394_vm11, %v1032_v12  ;;  %vm387_vm9 = vcmp.eq.s32.totalorder %v1235_v22, %v1292_v28  ;;  %vm386_vm11 = vcmp.eq.s32.totalorder %v1235_v22, %v1306_v29 }
  0x48   :  { %942 = vmatpush.msk.msrb.mxu3 %vm538_vm8, %v1032_v12  ;;  %926 = vmatpush.msk.msrb.mxu2 %vm537_vm10, %v1032_v12  ;;  %vm388_vm8 = vcmp.eq.s32.totalorder %v1220_v21, %v1306_v29  ;;  %vm529_vm10 = vcmp.eq.s32.totalorder %v1056_v1, %v1272_v26 }
  0x49   :  { %348 = vmatmul.f32.vlgmr.msra.gmra.mxu2 %v49_v30  ;;  %877 = vmatpush.msk.msrb.mxu1 %vm393_vm13, %v1032_v12  ;;  %vm384_vm13 = vcmp.eq.s32.totalorder %v1250_v23, %v1306_v29 }
  0x4a   :  { %943 = vmatpush.msk.msrb.mxu3 %vm536_vm12, %v1032_v12  ;;  %927 = vmatpush.msk.msrb.mxu2 %vm535_vm14, %v1032_v12  ;;  %vm385_vm12 = vcmp.eq.s32.totalorder %v1250_v23, %v1292_v28  ;;  %vm383_vm14 = vcmp.eq.s32.totalorder %v1056_v1, %v1292_v28 }
  0x4b   :  { %861 = vmatpush.msk.msrb.mxu0 %vm392_vm0, %v1032_v12  ;;  %878 = vmatpush.msk.msrb.mxu1 %vm391_vm1, %v1032_v12  ;;  %vm227_vm0 = vcmask 1043456  }
  0x4c   :  { %944 = vmatpush.msk.msrb.mxu3 %vm534_vm15, %v1032_v12  ;;  %928 = vmatpush.msk.msrb.mxu2 %vm533_vm2, %v1032_v12  ;;  %vm382_vm15 = vcmp.eq.s32.totalorder %v1056_v1, %v1306_v29 }
  0x4d   :  { %220 = vmatmul.f32.vlgmr.msra.gmra.mxu1 %v49_v30  ;;  %862 = vmatpush.msk.msrb.mxu0 %vm390_vm4, %v1032_v12 }
  0x4e   :  { %945 = vmatpush.msk.msrb.mxu3 %vm532_vm3, %v1032_v12  ;;  %879 = vmatpush.msk.msrb.mxu1 %vm389_vm5, %v1032_v12 }
  0x4f   :  { %929 = vmatpush.msk.msrb.mxu2 %vm531_vm6, %v1032_v12  ;;  %200 = vmatmul.f32.vlgmr.msra.gmra.mxu0 %v49_v30 }
  0x50   :  { %946 = vmatpush.msk.msrb.mxu3 %vm530_vm7, %v1032_v12  ;;  %863 = vmatpush.msk.msrb.mxu0 %vm388_vm8, %v1032_v12 }
  0x51   :  { %662 = vmatmul.f32.vlgmr.msrb.gmra.mxu3 %v49_v30  ;;  %880 = vmatpush.msk.msrb.mxu1 %vm387_vm9, %v1032_v12 }
  0x52   :  { %930 = vmatpush.msk.msrb.mxu2 %vm529_vm10, %v1032_v12  ;;  %864 = vmatpush.msk.msrb.mxu0 %vm386_vm11, %v1032_v12 }
  0x53   :  { %642 = vmatmul.f32.vlgmr.msrb.gmra.mxu2 %v49_v30  ;;  %881 = vmatpush.msk.msrb.mxu1 %vm385_vm12, %v1032_v12 }
  0x54   :  { %865 = vmatpush.msk.msrb.mxu0 %vm384_vm13, %v1032_v12 }
  0x55   :  { %882 = vmatpush.msk.msrb.mxu1 %vm383_vm14, %v1032_v12 }
  0x56   :  { %515 = vmatmul.f32.vlgmr.msrb.gmra.mxu1 %v49_v30  ;;  %866 = vmatpush.msk.msrb.mxu0 %vm382_vm15, %v1032_v12 }
  0x57   :  { %495 = vmatmul.f32.vlgmr.msrb.gmra.mxu0 %v49_v30 }
  0xc8   :  { %v369_v32 = vpop.f32.mrf.mxu3 }
  0xc9   :  { %v374_v34 = vrot.slane %v369_v32, 4 }
  0xca   :  { %v221_v33 = vpop.f32.mrf.mxu1 }
  0xcb   :  { %v226_v35 = vrot.slane %v221_v33, 4 }
  0xcc   :  { %v349_v38 = vpop.f32.mrf.mxu2  ;;  %v201_v39 = vpop.f32.mrf.mxu0 }
  0xcd   :  { %v375_v40 = vsel %vm227_vm0, %v349_v38, %v374_v34  ;;  %v228_v41 = vsel %vm227_vm0, %v201_v39, %v226_v35 }
  0xce   :  { %v377_v42 = vadd.f32 %v375_v40, %v331_v36  ;;  %v230_v43 = vadd.f32 %v228_v41, %v183_v37 }
  0xd0   :  { %378 = vst [vmem:[#allocation7 + $0x8] sm:$0x77] %v377_v42 }
  0xd1   :  { %231 = vst [vmem:[#allocation7] sm:$0x77] %v230_v43 }
  0xd3   :  { %v516_v45 = vpop.f32.mrf.mxu1 }
  0xd4   :  { %v663_v44 = vpop.f32.mrf.mxu3  ;;  %v521_v47 = vrot.slane %v516_v45, 4  ;;  %v496_v49 = vpop.f32.mrf.mxu0 }
  0xd5   :  { %v668_v46 = vrot.slane %v663_v44, 4 }
  0xd6   :  { %v643_v51 = vpop.f32.mrf.mxu2  ;;  %v522_v52 = vsel %vm227_vm0, %v496_v49, %v521_v47 }
  0xd7   :  { %v669_v53 = vsel %vm227_vm0, %v643_v51, %v668_v46  ;;  %v524_v54 = vadd.f32 %v522_v52, %v478_v48 }
  0xd8   :  { %v671_v55 = vadd.f32 %v669_v53, %v625_v50 }
  0xd9   :  { %525 = vst [vmem:[#allocation7 + $0x10] sm:$0x77] %v524_v54 }
  0xda   :  { %672 = vst [vmem:[#allocation7 + $0x18] sm:$0x77] %v671_v55 }
  0xdb   :  { %683 = dma.vmem_to_hbm [thread:$0]  %s679_s1, 512, %s681_s21, [#allocation4]  }
  0xdc   :  { %1028 = dma.done.wait [#allocation4], 512  }
  0xdd   :  { %1029 = vsyncadd [#allocation4], 4294966784 }
  0xde   :  { %688 = vsyncpa [#allocation3], 1 }
  0xdf   :  { %689 = vsyncpa [#allocation6], 1 }
  0xe0   :  { %690 = vsyncpa [#allocation4], 1 }

</bundles_post_ra>
